<compile_context>
chip_gen: v7x
topology: tpu7x:2x2x1
jax: 0.10.0
libtpu: 0.0.40
codegen_flags: <defaults>
</compile_context>

<pallas_src>
import math
import functools

import jax
import jax.numpy as jnp
from jax.experimental import pallas as pl
from jax.experimental.pallas import tpu as pltpu


def _attention_kernel(x_ref, kv_ref, wq_ref, wk_ref, wv_ref, wo_ref, b_ref,
                      o_ref, kh_sc, vh_sc, *,
                      num_heads, head_dim, approx_recip):
    """One (batch, q-tile) grid step.

    x_ref  : (1, tq, H)   query-side tokens (compute dtype)
    kv_ref : (1, Skv, H)  key/value-side tokens (compute dtype)
    w*_ref : (H, H)       pre-transposed (in, out) weights; 1/sqrt(hd) folded into wq
    b_ref  : (4, H) f32   packed biases [bq (scaled), bk, bv, bo]
    o_ref  : (1, tq, H)   output tile
    kh_sc  : (nh, Skv, hd) VMEM  cached K heads (filled at qi == 0)
    vh_sc  : (nh, Skv, hd) VMEM  cached V heads (filled at qi == 0)
    """
    qi = pl.program_id(1)
    x = x_ref[0]                                   # (tq, H)
    dt = x.dtype
    hd = head_dim

    bq = b_ref[0]                                  # (H,) f32 (already scaled)
    bk = b_ref[1]
    bv = b_ref[2]
    bo = b_ref[3]

    def split_heads(y):                            # (S, H) -> (nh, S, hd)
        return jnp.stack(
            [y[:, h * hd:(h + 1) * hd] for h in range(num_heads)], axis=0)

    # --- K/V projection: invariant across query tiles; cache once per batch. ---
    @pl.when(qi == 0)
    def _():
        kv = kv_ref[0]                             # (Skv, H)
        k = jnp.dot(kv, wk_ref[...], preferred_element_type=jnp.float32) + bk
        v = jnp.dot(kv, wv_ref[...], preferred_element_type=jnp.float32) + bv
        kh_sc[...] = split_heads(k.astype(dt))
        vh_sc[...] = split_heads(v.astype(dt))

    # --- Q projection (softmax scale already folded into wq/bq). ---
    q = jnp.dot(x, wq_ref[...], preferred_element_type=jnp.float32) + bq
    qh = split_heads(q.astype(dt))                 # (nh, tq, hd)

    kh = kh_sc[...]                                # (nh, Skv, hd)
    vh = vh_sc[...]

    # --- Head-batched attention; K used untransposed (last-dim contraction). ---
    s = jnp.einsum("hqd,hkd->hqk", qh, kh,
                   preferred_element_type=jnp.float32)      # (nh, tq, Skv) f32
    s = s - jnp.max(s, axis=-1, keepdims=True)
    p = jnp.exp(s)
    denom = jnp.sum(p, axis=-1, keepdims=True)
    if approx_recip:
        probs = p * pl.reciprocal(denom, approx=True)       # EUP slot
    else:
        probs = p / denom
    # attn_dropout is identity in eval mode.

    ctx = jnp.einsum("hqk,hkd->hqd", probs.astype(dt), vh,
                     preferred_element_type=jnp.float32)    # (nh, tq, hd)
    ctx = ctx.astype(dt)
    # Recombine heads into a single lane-dense (tq, H) slab.
    ctx2 = jnp.concatenate([ctx[h] for h in range(num_heads)], axis=-1)

    # Output projection: one dense matmul with full-H contraction.
    out = jnp.dot(ctx2, wo_ref[...], preferred_element_type=jnp.float32) + bo
    # proj_dropout is identity in eval mode.
    o_ref[0] = out.astype(o_ref.dtype)


def attention_cross_modal(hidden_states, kv, params, *, num_heads,
                          q_tile=256, compute_dtype=None,
                          approx_reciprocal=True):
    """hidden_states: (B, Sq, H); kv: (B, Skv, H). Returns (B, Sq, H)."""
    B, Sq, H = hidden_states.shape
    Bk, Skv, Hk = kv.shape
    assert Bk == B and Hk == H, "hidden_states / kv shape mismatch"
    assert H % num_heads == 0, "hidden_size must be divisible by num_heads"
    head_dim = H // num_heads
    scale = 1.0 / math.sqrt(head_dim)

    out_dtype = hidden_states.dtype
    cdt = jnp.dtype(compute_dtype) if compute_dtype is not None else jnp.dtype(out_dtype)

    # Query-sequence tile: largest divisor of Sq not exceeding q_tile
    # (256 matches the v6e/v7x MXU tile; tiny Sq collapses to a single step).
    tq = min(Sq, q_tile)
    while Sq % tq:
        tq -= 1

    # Pre-transpose weights to (in, out); fold the softmax scale into Q.
    wqT = (params["wq"].T * scale).astype(cdt)
    wkT = params["wk"].T.astype(cdt)
    wvT = params["wv"].T.astype(cdt)
    woT = params["wo"].T.astype(cdt)
    # Pack the four biases into one (4, H) f32 input (fewer DMA descriptors).
    biases = jnp.stack([params["bq"] * scale, params["bk"],
                        params["bv"], params["bo"]], axis=0).astype(jnp.float32)

    x_c = hidden_states.astype(cdt)
    kv_c = kv.astype(cdt)

    kernel = functools.partial(_attention_kernel, num_heads=num_heads,
                               head_dim=head_dim, approx_recip=approx_reciprocal)

    weight_spec = pl.BlockSpec((H, H), lambda b, qi: (0, 0))
    bias_spec = pl.BlockSpec((4, H), lambda b, qi: (0, 0))

    # Rough VMEM budget (padded to the (8,128) tile), doubled for pipelining,
    # floored at 32 MiB (v5e default scoped limit is 16 MiB) and capped to stay
    # inside v7x's 64 MiB physical VMEM.
    def pad(a, m):
        return -(-a // m) * m
    csz = cdt.itemsize
    est = (4 * pad(H, 8) * pad(H, 128) * csz * 2                               # weights
           + 2 * pad(4, 8) * pad(H, 128) * 4                                   # biases
           + 2 * pad(tq, 8) * pad(H, 128) * (csz + jnp.dtype(out_dtype).itemsize)  # x / out
           + 2 * pad(Skv, 8) * pad(H, 128) * csz                               # kv
           + 2 * num_heads * pad(Skv, 8) * pad(head_dim, 128) * csz            # K/V cache
           + 3 * num_heads * pad(tq, 8) * pad(Skv, 128) * 4)                   # scores/probs
    vmem_limit = int(max(32 * 2**20, min(2 * est, 60 * 2**20)))

    return pl.pallas_call(
        kernel,
        out_shape=jax.ShapeDtypeStruct((B, Sq, H), out_dtype),
        grid_spec=pltpu.PrefetchScalarGridSpec(
            num_scalar_prefetch=0,
            grid=(B, Sq // tq),
            in_specs=[
                pl.BlockSpec((1, tq, H), lambda b, qi: (b, qi, 0)),    # hidden_states
                pl.BlockSpec((1, Skv, H), lambda b, qi: (b, 0, 0)),    # kv
                weight_spec,   # wq (scale folded in)
                weight_spec,   # wk
                weight_spec,   # wv
                weight_spec,   # wo
                bias_spec,     # packed biases (bq scaled)
            ],
            out_specs=pl.BlockSpec((1, tq, H), lambda b, qi: (b, qi, 0)),
            scratch_shapes=[
                pltpu.VMEM((num_heads, Skv, head_dim), cdt),   # cached K heads
                pltpu.VMEM((num_heads, Skv, head_dim), cdt),   # cached V heads
            ],
        ),
        # "arbitrary" on the q-tile axis keeps each batch's qi steps on a single
        # core, so the @pl.when(qi == 0) K/V cache fill stays valid on megacore.
        compiler_params=pltpu.CompilerParams(
            dimension_semantics=("parallel", "arbitrary"),
            vmem_limit_bytes=vmem_limit),
    )(x_c, kv_c, wqT, wkT, wvT, woT, biases)


def _reference(hidden_states, kv, params, *, num_heads):
    """Plain-JAX reference mirroring the PyTorch forward (eval mode)."""
    B, Sq, H = hidden_states.shape
    _, Skv, _ = kv.shape
    hd = H // num_heads

    def linear(x, w, b):
        return jnp.einsum("bsh,oh->bso", x, w) + b

    q = linear(hidden_states, params["wq"], params["bq"])
    k = linear(kv, params["wk"], params["bk"])
    v = linear(kv, params["wv"], params["bv"])

    def split(x, s):
        return x.reshape(B, s, num_heads, hd).transpose(0, 2, 1, 3)

    qh, kh, vh = split(q, Sq), split(k, Skv), split(v, Skv)
    scores = jnp.einsum("bhqd,bhkd->bhqk", qh, kh) / math.sqrt(hd)
    probs = jax.nn.softmax(scores, axis=-1)
    ctx = jnp.einsum("bhqk,bhkd->bhqd", probs, vh)
    ctx = ctx.transpose(0, 2, 1, 3).reshape(B, Sq, H)
    return linear(ctx, params["wo"], params["bo"])


if __name__ == "__main__":
    # Small config consistent with the module: hidden=32, num_heads=4 (head_dim=8).
    B, Sq, Skv, H = 2, 16, 8, 32
    NUM_HEADS = 4

    key = jax.random.PRNGKey(0)
    keys = jax.random.split(key, 10)
    init_scale = 0.02

    params = {
        "wq": init_scale * jax.random.normal(keys[0], (H, H), jnp.float32),
        "bq": init_scale * jax.random.normal(keys[1], (H,), jnp.float32),
        "wk": init_scale * jax.random.normal(keys[2], (H, H), jnp.float32),
        "bk": init_scale * jax.random.normal(keys[3], (H,), jnp.float32),
        "wv": init_scale * jax.random.normal(keys[4], (H, H), jnp.float32),
        "bv": init_scale * jax.random.normal(keys[5], (H,), jnp.float32),
        "wo": init_scale * jax.random.normal(keys[6], (H, H), jnp.float32),
        "bo": init_scale * jax.random.normal(keys[7], (H,), jnp.float32),
    }

    hidden_states = jax.random.normal(keys[8], (B, Sq, H), jnp.float32)
    kv = jax.random.normal(keys[9], (B, Skv, H), jnp.float32)

    ref = _reference(hidden_states, kv, params, num_heads=NUM_HEADS)

    # Native-f32 compute path: tight tolerance (approx reciprocal + folded scale
    # are tiny relative perturbations).
    out_f32 = attention_cross_modal(hidden_states, kv, params, num_heads=NUM_HEADS)
    out_f32 = jax.block_until_ready(out_f32)
    assert out_f32.shape == (B, Sq, H)
    assert jnp.allclose(out_f32, ref, atol=1e-3, rtol=1e-3), (
        float(jnp.max(jnp.abs(out_f32 - ref))))

    # Recommended production path: bf16 MXU operands, f32 accumulation / stats.
    out_bf16 = attention_cross_modal(hidden_states, kv, params,
                                     num_heads=NUM_HEADS,
                                     compute_dtype=jnp.bfloat16)
    out_bf16 = jax.block_until_ready(out_bf16)
    assert jnp.allclose(out_bf16, ref, atol=3e-2, rtol=3e-2), (
        float(jnp.max(jnp.abs(out_bf16 - ref))))

    print("KERNEL_OK")
</pallas_src>

<mosaic_0001>
module attributes {stable_mosaic.version = 11 : i64} {
  func.func @_attention_kernel(%arg0: i32, %arg1: i32, %arg2: memref<1x16x32xf32, #tpu.memory_space<vmem>>, %arg3: memref<1x8x32xf32, #tpu.memory_space<vmem>>, %arg4: memref<32x32xf32, #tpu.memory_space<vmem>>, %arg5: memref<32x32xf32, #tpu.memory_space<vmem>>, %arg6: memref<32x32xf32, #tpu.memory_space<vmem>>, %arg7: memref<32x32xf32, #tpu.memory_space<vmem>>, %arg8: memref<4x32xf32, #tpu.memory_space<vmem>>, %arg9: memref<1x16x32xf32, #tpu.memory_space<vmem>>, %arg10: memref<4x8x8xf32, #tpu.memory_space<vmem>>, %arg11: memref<4x8x8xf32, #tpu.memory_space<vmem>>) attributes {dimension_semantics = [#tpu.dimension_semantics<parallel>, #tpu.dimension_semantics<arbitrary>], iteration_bounds = array<i64: 2, 1>, scalar_prefetch = 0 : i64, scratch_operands = 2 : i64, tpu.core_type = #tpu.core_type<tc>, window_params = [{transform_indices = @transform_0, window_bounds = array<i64: 1, 16, 32>}, {transform_indices = @transform_1, window_bounds = array<i64: 1, 8, 32>}, {pipeline_mode = #tpu.pipeline_mode<synchronous>, transform_indices = @transform_2, window_bounds = array<i64: 32, 32>}, {pipeline_mode = #tpu.pipeline_mode<synchronous>, transform_indices = @transform_3, window_bounds = array<i64: 32, 32>}, {pipeline_mode = #tpu.pipeline_mode<synchronous>, transform_indices = @transform_4, window_bounds = array<i64: 32, 32>}, {pipeline_mode = #tpu.pipeline_mode<synchronous>, transform_indices = @transform_5, window_bounds = array<i64: 32, 32>}, {pipeline_mode = #tpu.pipeline_mode<synchronous>, transform_indices = @transform_6, window_bounds = array<i64: 4, 32>}, {transform_indices = @transform_7, window_bounds = array<i64: 1, 16, 32>}]} {
    %c0 = arith.constant 0 : index
    %c0_0 = arith.constant 0 : index
    %c0_1 = arith.constant 0 : index
    %0 = vector.load %arg2[%c0, %c0_0, %c0_1] : memref<1x16x32xf32, #tpu.memory_space<vmem>>, vector<1x16x32xf32>
    %1 = vector.shape_cast %0 : vector<1x16x32xf32> to vector<16x32xf32>
    %c0_2 = arith.constant 0 : index
    %c0_3 = arith.constant 0 : index
    %2 = vector.load %arg8[%c0_2, %c0_3] : memref<4x32xf32, #tpu.memory_space<vmem>>, vector<1x32xf32>
    %3 = vector.shape_cast %2 : vector<1x32xf32> to vector<32xf32>
    %c1 = arith.constant 1 : index
    %c0_4 = arith.constant 0 : index
    %4 = vector.load %arg8[%c1, %c0_4] : memref<4x32xf32, #tpu.memory_space<vmem>>, vector<1x32xf32>
    %5 = vector.shape_cast %4 : vector<1x32xf32> to vector<32xf32>
    %c2 = arith.constant 2 : index
    %c0_5 = arith.constant 0 : index
    %6 = vector.load %arg8[%c2, %c0_5] : memref<4x32xf32, #tpu.memory_space<vmem>>, vector<1x32xf32>
    %7 = vector.shape_cast %6 : vector<1x32xf32> to vector<32xf32>
    %c3 = arith.constant 3 : index
    %c0_6 = arith.constant 0 : index
    %8 = vector.load %arg8[%c3, %c0_6] : memref<4x32xf32, #tpu.memory_space<vmem>>, vector<1x32xf32>
    %9 = vector.shape_cast %8 : vector<1x32xf32> to vector<32xf32>
    %c0_i32 = arith.constant 0 : i32
    %10 = arith.cmpi eq, %arg1, %c0_i32 : i32
    %11 = arith.extui %10 : i1 to i32
    %c0_i32_7 = arith.constant 0 : i32
    %12 = arith.cmpi ne, %11, %c0_i32_7 : i32
    scf.if %12 {
      %c0_26 = arith.constant 0 : index
      %c0_27 = arith.constant 0 : index
      %c0_28 = arith.constant 0 : index
      %58 = vector.load %arg3[%c0_26, %c0_27, %c0_28] : memref<1x8x32xf32, #tpu.memory_space<vmem>>, vector<1x8x32xf32>
      %59 = vector.shape_cast %58 : vector<1x8x32xf32> to vector<8x32xf32>
      %c0_29 = arith.constant 0 : index
      %c0_30 = arith.constant 0 : index
      %60 = vector.load %arg5[%c0_29, %c0_30] : memref<32x32xf32, #tpu.memory_space<vmem>>, vector<32x32xf32>
      %cst_31 = arith.constant dense<0.000000e+00> : vector<8x32xf32>
      %61 = tpu.matmul %59, %60, %cst_31 {dimension_numbers = #tpu.dot_dimension_numbers<[1], [0], [0], [1], [0, 0, 1, 1], [], []>} : vector<8x32xf32>, vector<32x32xf32>, vector<8x32xf32> -> vector<8x32xf32>
      %62 = vector.shape_cast %5 : vector<32xf32> to vector<1x32xf32>
      %63 = vector.broadcast %62 : vector<1x32xf32> to vector<8x32xf32>
      %64 = arith.addf %61, %63 : vector<8x32xf32>
      %c0_32 = arith.constant 0 : index
      %c0_33 = arith.constant 0 : index
      %65 = vector.load %arg6[%c0_32, %c0_33] : memref<32x32xf32, #tpu.memory_space<vmem>>, vector<32x32xf32>
      %cst_34 = arith.constant dense<0.000000e+00> : vector<8x32xf32>
      %66 = tpu.matmul %59, %65, %cst_34 {dimension_numbers = #tpu.dot_dimension_numbers<[1], [0], [0], [1], [0, 0, 1, 1], [], []>} : vector<8x32xf32>, vector<32x32xf32>, vector<8x32xf32> -> vector<8x32xf32>
      %67 = vector.shape_cast %7 : vector<32xf32> to vector<1x32xf32>
      %68 = vector.broadcast %67 : vector<1x32xf32> to vector<8x32xf32>
      %69 = arith.addf %66, %68 : vector<8x32xf32>
      %70 = vector.extract_strided_slice %64 {offsets = [0, 0], sizes = [8, 8], strides = [1, 1]} : vector<8x32xf32> to vector<8x8xf32>
      %71 = vector.extract_strided_slice %64 {offsets = [0, 8], sizes = [8, 8], strides = [1, 1]} : vector<8x32xf32> to vector<8x8xf32>
      %72 = vector.extract_strided_slice %64 {offsets = [0, 16], sizes = [8, 8], strides = [1, 1]} : vector<8x32xf32> to vector<8x8xf32>
      %73 = vector.extract_strided_slice %64 {offsets = [0, 24], sizes = [8, 8], strides = [1, 1]} : vector<8x32xf32> to vector<8x8xf32>
      %74 = vector.shape_cast %70 : vector<8x8xf32> to vector<1x8x8xf32>
      %75 = vector.shape_cast %71 : vector<8x8xf32> to vector<1x8x8xf32>
      %76 = vector.shape_cast %72 : vector<8x8xf32> to vector<1x8x8xf32>
      %77 = vector.shape_cast %73 : vector<8x8xf32> to vector<1x8x8xf32>
      %78 = tpu.concatenate %74, %75, %76, %77 in 0 : vector<1x8x8xf32>, vector<1x8x8xf32>, vector<1x8x8xf32>, vector<1x8x8xf32> -> vector<4x8x8xf32>
      %c0_35 = arith.constant 0 : index
      %c0_36 = arith.constant 0 : index
      %c0_37 = arith.constant 0 : index
      %79 = vector.load %arg10[%c0_35, %c0_36, %c0_37] : memref<4x8x8xf32, #tpu.memory_space<vmem>>, vector<4x8x8xf32>
      tpu.vector_store %arg10[%c0_35, %c0_36, %c0_37], %78 {strides = array<i32>} : memref<4x8x8xf32, #tpu.memory_space<vmem>>, vector<4x8x8xf32>,
      %80 = vector.extract_strided_slice %69 {offsets = [0, 0], sizes = [8, 8], strides = [1, 1]} : vector<8x32xf32> to vector<8x8xf32>
      %81 = vector.extract_strided_slice %69 {offsets = [0, 8], sizes = [8, 8], strides = [1, 1]} : vector<8x32xf32> to vector<8x8xf32>
      %82 = vector.extract_strided_slice %69 {offsets = [0, 16], sizes = [8, 8], strides = [1, 1]} : vector<8x32xf32> to vector<8x8xf32>
      %83 = vector.extract_strided_slice %69 {offsets = [0, 24], sizes = [8, 8], strides = [1, 1]} : vector<8x32xf32> to vector<8x8xf32>
      %84 = vector.shape_cast %80 : vector<8x8xf32> to vector<1x8x8xf32>
      %85 = vector.shape_cast %81 : vector<8x8xf32> to vector<1x8x8xf32>
      %86 = vector.shape_cast %82 : vector<8x8xf32> to vector<1x8x8xf32>
      %87 = vector.shape_cast %83 : vector<8x8xf32> to vector<1x8x8xf32>
      %88 = tpu.concatenate %84, %85, %86, %87 in 0 : vector<1x8x8xf32>, vector<1x8x8xf32>, vector<1x8x8xf32>, vector<1x8x8xf32> -> vector<4x8x8xf32>
      %c0_38 = arith.constant 0 : index
      %c0_39 = arith.constant 0 : index
      %c0_40 = arith.constant 0 : index
      %89 = vector.load %arg11[%c0_38, %c0_39, %c0_40] : memref<4x8x8xf32, #tpu.memory_space<vmem>>, vector<4x8x8xf32>
      tpu.vector_store %arg11[%c0_38, %c0_39, %c0_40], %88 {strides = array<i32>} : memref<4x8x8xf32, #tpu.memory_space<vmem>>, vector<4x8x8xf32>,
    } else {
    }
    %c0_8 = arith.constant 0 : index
    %c0_9 = arith.constant 0 : index
    %13 = vector.load %arg4[%c0_8, %c0_9] : memref<32x32xf32, #tpu.memory_space<vmem>>, vector<32x32xf32>
    %cst = arith.constant dense<0.000000e+00> : vector<16x32xf32>
    %14 = tpu.matmul %1, %13, %cst {dimension_numbers = #tpu.dot_dimension_numbers<[1], [0], [0], [1], [0, 0, 1, 1], [], []>} : vector<16x32xf32>, vector<32x32xf32>, vector<16x32xf32> -> vector<16x32xf32>
    %15 = vector.shape_cast %3 : vector<32xf32> to vector<1x32xf32>
    %16 = vector.broadcast %15 : vector<1x32xf32> to vector<16x32xf32>
    %17 = arith.addf %14, %16 : vector<16x32xf32>
    %18 = vector.extract_strided_slice %17 {offsets = [0, 0], sizes = [16, 8], strides = [1, 1]} : vector<16x32xf32> to vector<16x8xf32>
    %19 = vector.extract_strided_slice %17 {offsets = [0, 8], sizes = [16, 8], strides = [1, 1]} : vector<16x32xf32> to vector<16x8xf32>
    %20 = vector.extract_strided_slice %17 {offsets = [0, 16], sizes = [16, 8], strides = [1, 1]} : vector<16x32xf32> to vector<16x8xf32>
    %21 = vector.extract_strided_slice %17 {offsets = [0, 24], sizes = [16, 8], strides = [1, 1]} : vector<16x32xf32> to vector<16x8xf32>
    %22 = vector.shape_cast %18 : vector<16x8xf32> to vector<1x16x8xf32>
    %23 = vector.shape_cast %19 : vector<16x8xf32> to vector<1x16x8xf32>
    %24 = vector.shape_cast %20 : vector<16x8xf32> to vector<1x16x8xf32>
    %25 = vector.shape_cast %21 : vector<16x8xf32> to vector<1x16x8xf32>
    %26 = tpu.concatenate %22, %23, %24, %25 in 0 : vector<1x16x8xf32>, vector<1x16x8xf32>, vector<1x16x8xf32>, vector<1x16x8xf32> -> vector<4x16x8xf32>
    %c0_10 = arith.constant 0 : index
    %c0_11 = arith.constant 0 : index
    %c0_12 = arith.constant 0 : index
    %27 = vector.load %arg10[%c0_10, %c0_11, %c0_12] : memref<4x8x8xf32, #tpu.memory_space<vmem>>, vector<4x8x8xf32>
    %c0_13 = arith.constant 0 : index
    %c0_14 = arith.constant 0 : index
    %c0_15 = arith.constant 0 : index
    %28 = vector.load %arg11[%c0_13, %c0_14, %c0_15] : memref<4x8x8xf32, #tpu.memory_space<vmem>>, vector<4x8x8xf32>
    "tpu.trace_start"() <{level = 10 : i32, message = "hqd,hkd->hqk"}> : () -> ()
    %cst_16 = arith.constant dense<0.000000e+00> : vector<4x16x8xf32>
    %29 = tpu.matmul %26, %27, %cst_16 {dimension_numbers = #tpu.dot_dimension_numbers<[2], [2], [1], [1], [0, 0, 0, 1, 1, 1], [0], [0]>} : vector<4x16x8xf32>, vector<4x8x8xf32>, vector<4x16x8xf32> -> vector<4x16x8xf32>
    "tpu.trace_stop"() : () -> ()
    %cst_17 = arith.constant dense<0xFF800000> : vector<4x16xf32>
    %30 = vector.multi_reduction <maximumf>, %29, %cst_17 [2] : vector<4x16x8xf32> to vector<4x16xf32>
    %31 = vector.shape_cast %30 : vector<4x16xf32> to vector<4x16x1xf32>
    %32 = vector.broadcast %31 : vector<4x16x1xf32> to vector<4x16x8xf32>
    %33 = arith.subf %29, %32 : vector<4x16x8xf32>
    %34 = math.exp %33 : vector<4x16x8xf32>
    %cst_18 = arith.constant dense<0.000000e+00> : vector<4x16xf32>
    %35 = vector.multi_reduction <add>, %34, %cst_18 [2] : vector<4x16x8xf32> to vector<4x16xf32>
    %36 = vector.shape_cast %35 : vector<4x16xf32> to vector<4x16x1xf32>
    %37 = tpu.reciprocal %36 {approx = true} : vector<4x16x1xf32> -> vector<4x16x1xf32>
    %38 = vector.broadcast %37 : vector<4x16x1xf32> to vector<4x16x8xf32>
    %39 = arith.mulf %34, %38 : vector<4x16x8xf32>
    "tpu.trace_start"() <{level = 10 : i32, message = "hqk,hkd->hqd"}> : () -> ()
    %cst_19 = arith.constant dense<0.000000e+00> : vector<4x16x8xf32>
    %40 = tpu.matmul %39, %28, %cst_19 {dimension_numbers = #tpu.dot_dimension_numbers<[2], [1], [1], [2], [0, 0, 0, 1, 1, 2], [0], [0]>} : vector<4x16x8xf32>, vector<4x8x8xf32>, vector<4x16x8xf32> -> vector<4x16x8xf32>
    "tpu.trace_stop"() : () -> ()
    %41 = vector.extract_strided_slice %40 {offsets = [0, 0, 0], sizes = [1, 16, 8], strides = [1, 1, 1]} : vector<4x16x8xf32> to vector<1x16x8xf32>
    %42 = vector.shape_cast %41 : vector<1x16x8xf32> to vector<16x8xf32>
    %43 = vector.extract_strided_slice %40 {offsets = [1, 0, 0], sizes = [1, 16, 8], strides = [1, 1, 1]} : vector<4x16x8xf32> to vector<1x16x8xf32>
    %44 = vector.shape_cast %43 : vector<1x16x8xf32> to vector<16x8xf32>
    %45 = vector.extract_strided_slice %40 {offsets = [2, 0, 0], sizes = [1, 16, 8], strides = [1, 1, 1]} : vector<4x16x8xf32> to vector<1x16x8xf32>
    %46 = vector.shape_cast %45 : vector<1x16x8xf32> to vector<16x8xf32>
    %47 = vector.extract_strided_slice %40 {offsets = [3, 0, 0], sizes = [1, 16, 8], strides = [1, 1, 1]} : vector<4x16x8xf32> to vector<1x16x8xf32>
    %48 = vector.shape_cast %47 : vector<1x16x8xf32> to vector<16x8xf32>
    %49 = tpu.concatenate %42, %44, %46, %48 in 1 : vector<16x8xf32>, vector<16x8xf32>, vector<16x8xf32>, vector<16x8xf32> -> vector<16x32xf32>
    %c0_20 = arith.constant 0 : index
    %c0_21 = arith.constant 0 : index
    %50 = vector.load %arg7[%c0_20, %c0_21] : memref<32x32xf32, #tpu.memory_space<vmem>>, vector<32x32xf32>
    %cst_22 = arith.constant dense<0.000000e+00> : vector<16x32xf32>
    %51 = tpu.matmul %49, %50, %cst_22 {dimension_numbers = #tpu.dot_dimension_numbers<[1], [0], [0], [1], [0, 0, 1, 1], [], []>} : vector<16x32xf32>, vector<32x32xf32>, vector<16x32xf32> -> vector<16x32xf32>
    %52 = vector.shape_cast %9 : vector<32xf32> to vector<1x32xf32>
    %53 = vector.broadcast %52 : vector<1x32xf32> to vector<16x32xf32>
    %54 = arith.addf %51, %53 : vector<16x32xf32>
    %c0_23 = arith.constant 0 : index
    %c0_24 = arith.constant 0 : index
    %c0_25 = arith.constant 0 : index
    %55 = vector.load %arg9[%c0_23, %c0_24, %c0_25] : memref<1x16x32xf32, #tpu.memory_space<vmem>>, vector<1x16x32xf32>
    %56 = vector.shape_cast %55 : vector<1x16x32xf32> to vector<16x32xf32>
    %57 = vector.shape_cast %54 : vector<16x32xf32> to vector<1x16x32xf32>
    tpu.vector_store %arg9[%c0_23, %c0_24, %c0_25], %57 {strides = array<i32>} : memref<1x16x32xf32, #tpu.memory_space<vmem>>, vector<1x16x32xf32>,
    return
  }
  func.func @transform_0(%arg0: i32, %arg1: i32) -> (i32, i32, i32) {
    %c0_i32 = arith.constant 0 : i32
    %c0_i32_0 = arith.constant 0 : i32
    return %arg0, %arg1, %c0_i32 : i32, i32, i32
  }
  func.func @transform_1(%arg0: i32, %arg1: i32) -> (i32, i32, i32) {
    %c0_i32 = arith.constant 0 : i32
    %c0_i32_0 = arith.constant 0 : i32
    %c0_i32_1 = arith.constant 0 : i32
    return %arg0, %c0_i32, %c0_i32_0 : i32, i32, i32
  }
  func.func @transform_2(%arg0: i32, %arg1: i32) -> (i32, i32) {
    %c0_i32 = arith.constant 0 : i32
    %c0_i32_0 = arith.constant 0 : i32
    %c0_i32_1 = arith.constant 0 : i32
    return %c0_i32, %c0_i32_0 : i32, i32
  }
  func.func @transform_3(%arg0: i32, %arg1: i32) -> (i32, i32) {
    %c0_i32 = arith.constant 0 : i32
    %c0_i32_0 = arith.constant 0 : i32
    %c0_i32_1 = arith.constant 0 : i32
    return %c0_i32, %c0_i32_0 : i32, i32
  }
  func.func @transform_4(%arg0: i32, %arg1: i32) -> (i32, i32) {
    %c0_i32 = arith.constant 0 : i32
    %c0_i32_0 = arith.constant 0 : i32
    %c0_i32_1 = arith.constant 0 : i32
    return %c0_i32, %c0_i32_0 : i32, i32
  }
  func.func @transform_5(%arg0: i32, %arg1: i32) -> (i32, i32) {
    %c0_i32 = arith.constant 0 : i32
    %c0_i32_0 = arith.constant 0 : i32
    %c0_i32_1 = arith.constant 0 : i32
    return %c0_i32, %c0_i32_0 : i32, i32
  }
  func.func @transform_6(%arg0: i32, %arg1: i32) -> (i32, i32) {
    %c0_i32 = arith.constant 0 : i32
    %c0_i32_0 = arith.constant 0 : i32
    %c0_i32_1 = arith.constant 0 : i32
    return %c0_i32, %c0_i32_0 : i32, i32
  }
  func.func @transform_7(%arg0: i32, %arg1: i32) -> (i32, i32, i32) {
    %c0_i32 = arith.constant 0 : i32
    %c0_i32_0 = arith.constant 0 : i32
    return %arg0, %arg1, %c0_i32 : i32, i32, i32
  }
}

</mosaic_0001>

<bundles_post_ra>
// kernel: tpu_custom_call.1
= control target key start
LH: loop header
LB: loop body
LE: loop exit
PB: predicated region body
PF: predicated region fallthrough
CT: control target
= control target key end

     0   :  { %s2904_s0 = inlined_call_operand.hbm [shape: f32[2,16,32], index: 0, kind: input, shape index: {}]   ;;  %s2905_s1 = inlined_call_operand.hbm [shape: f32[2,8,32], index: 1, kind: input, shape index: {}]   ;;  %s2906_s2 = inlined_call_operand.hbm [shape: f32[32,32], index: 2, kind: input, shape index: {}]   ;;  %s2907_s3 = inlined_call_operand.hbm [shape: f32[32,32], index: 3, kind: input, shape index: {}]   ;;  %s2908_s4 = inlined_call_operand.hbm [shape: f32[32,32], index: 4, kind: input, shape index: {}]   ;;  %s2909_s5 = inlined_call_operand.hbm [shape: f32[32,32], index: 5, kind: input, shape index: {}]   ;;  %s2910_s6 = inlined_call_operand.vmem [shape: f32[4,32], index: 6, kind: input, shape index: {}]   ;;  %s2911_s7 = inlined_call_operand.hbm [shape: f32[2,16,32], index: 7, kind: output, shape index: {}]  }
   0x1   :  { %2920 = sst [smem:[#allocation24_spill]] %s2904_s0 }
   0x2   :  { %2921 = sst [smem:[#allocation25_spill]] %s2906_s2 }
   0x3   :  { %2922 = sst [smem:[#allocation26_spill]] %s2907_s3 }
   0x4   :  { %2923 = sst [smem:[#allocation27_spill]] %s2908_s4 }
   0x5   :  { %2924 = sst [smem:[#allocation28_spill]] %s2911_s7 }
   0x6   :  { %12 = vsyncpa [#allocation5], 0 }
   0x7   :  { %14 = vsyncpa [#allocation5 + $0x1], 0 }
   0x8   :  { %15 = vsyncpa [#allocation8], 0 }
   0x9   :  { %17 = vsyncpa [#allocation8 + $0x1], 0 }
   0xa   :  { %18 = vsyncpa [#allocation11], 0 }
   0xb   :  { %19 = vsyncpa [#allocation14], 0 }
   0xc   :  { %20 = vsyncpa [#allocation6], 0 }
   0xd   :  { %22 = vsyncpa [#allocation6 + $0x1], 0  ;;  %s2451_s24 = smov 0   ;;  %s2453_s25 = smov 0  }
   0xe   :  { %s2455_s26 = smov 0   ;;  %s2457_s27 = smov 0  }
   0xf   :  { %s2459_s28 = smov 0   ;;  %s2461_s29 = smov 0  }
  0x10 LB: > { %2925 = sst [smem:[#allocation22_spill]] %s2370_s24  ;;  %s2482_s30 = sadd.s32 4294967295, %s2390_s29   ;;  %s2390_s29 = sphi %s2461_s29, %s28_s29   ;;  %s2386_s28 = sphi %s2459_s28, %s2959_s28   ;;  %s2382_s27 = sphi %s2457_s27, %s2958_s27   ;;  %s2378_s26 = sphi %s2455_s26, %s2957_s26   ;;  %s2374_s25 = sphi %s2453_s25, %s2956_s25   ;;  %s2370_s24 = sphi %s2451_s24, %s2955_s24  }
  0x11   : > { %s1753_s8 = sadd.s32 4294967294, %s2390_s29   ;;  %p62_p0 = scmp.ne.s32.totalorder %s2374_s25, %s2370_s24 }
  0x12   : > { %p2912_p1 = scmp.eq.s32.totalorder %s2482_s30, 0  ;;  %p225_p3 = scmp.eq.s32.totalorder %s1753_s8, 1 }
  0x13   : > { %p1754_p5 = scmp.ge.s32.totalorder %s2390_s29, 1  ;;  %p232_p7 = scmp.lt.s32.totalorder %s2390_s29, 3 }
  0x14   : > { %p2491_p4 = por %p2912_p1, %p62_p0  ;;  %p2496_p6 = por %p225_p3, %p62_p0 }
  0x15   : > { %p2501_p8 = pnand %p1754_p5, %p232_p7  ;;  %s2392_s12 = smov [#allocation9]  }
  0x16   : > { %s2926_s9 = scalar_select %p2491_p4, 1, 0 }
  0x17   : > { %s2927_s10 = scalar_select %p2496_p6, 1, 0 }
  0x18   : > { %s2929_s11 = scalar_select %p2501_p8, 1, 0 }
  0x19   : > { %2928 = sst [smem:[#allocation23_spill]] %s2927_s10  ;;  %s244_s13 = sshll.u32 %s2392_s12, 4  ;;  %s2505_s13 = int_to_ptr.vmem [resolvable:$true] %s244_s13 }
  0x1a   : > { %p1990_p9 = pneg %p2501_p8  ;;  %s2393_s15 = smov [#allocation10]  }
  0x1b   : > { %s257_s16 = sshll.u32 %s2393_s15, 4  ;;  %s2394_s17 = smov [#allocation12]   ;;  %s2516_s16 = int_to_ptr.vmem [resolvable:$true] %s257_s16 }
  0x1c   : > { %p2512_p11 = pnand %p1990_p9, %p2912_p1  ;;  %s2518_s18 = sshll.u32 %s2394_s17, 4  ;;  %s271_s18 = int_to_ptr.vmem [resolvable:$true] %s2518_s18 }
  0x1d   : > { %s2931_s2 = sld [smem:[#allocation25_spill]] }
  0x1e   : > { %p2528_p13 = pneg %p2512_p11 }
  0x23   : > { %s2120_s21 = scalar_lea.hbm %s2931_s2, 512 }
  0x24   : > { %p2121_p12 = scmp.ne.s32.totalorder %s2931_s2, %s2120_s21  ;;  %p2127_p5 = scmp.lt.u32.totalorder %s2120_s21, %s2931_s2 }
  0x26   : > { %p2123_p0 = pnand %p2528_p13, %p2121_p12 }
  0x28   : > { %p2124_p3 = pneg %p2123_p0 }
  0x2a   : > { %p2129_p7 = pnand %p2127_p5, %p2124_p3 }
  0x2c   : > { %2132 = shalt.err (!%p2129_p7)
}
  0x2d   : > { %s2133_s17 = scalar_lea.vmem %s2505_s13, 512  ;;  %p2141_p2 = scmp.lt.s32.totalorder %s2505_s13, %s2505_s13 }
  0x2e   : > { %p2134_p9 = scmp.ne.s32.totalorder %s2505_s13, %s2133_s17  ;;  %p2142_p6 = scmp.lt.s32.totalorder %s2133_s17, %s2133_s17 }
  0x30   : > { %p2136_p10 = pnand %p2134_p9, %p2528_p13  ;;  %p2143_p12 = por %p2142_p6, %p2141_p2 }
  0x32   : > { %p2137_p1 = pneg %p2136_p10 }
  0x34   : > { %p2144_p0 = pnand %p2143_p12, %p2137_p1 }
  0x36   : > { %2147 = shalt.err (!%p2144_p0)
}
  0x37   : > { %s2918_s19 = smov 128   ;;  %s2396_s20 = smov 8  }
  0x38   : > { %1993 = dma.hbm_to_vmem [thread:$0]  (!%p2512_p11), %s2931_s2, 512, %s2505_s13, [#allocation8], %s2918_s19, %s2918_s19, %s2396_s20  }
  0x39   : > { %s2933_s3 = sld [smem:[#allocation26_spill]] }
  0x3f   : > { %s2148_s15 = scalar_lea.hbm %s2933_s3, 512 }
  0x40   : > { %p2149_p1 = scmp.ne.s32.totalorder %s2933_s3, %s2148_s15  ;;  %p2155_p10 = scmp.lt.u32.totalorder %s2148_s15, %s2933_s3 }
  0x42   : > { %p2151_p2 = pnand %p2149_p1, %p2528_p13 }
  0x44   : > { %p2152_p6 = pneg %p2151_p2 }
  0x46   : > { %p2157_p3 = pnand %p2155_p10, %p2152_p6 }
  0x48   : > { %2160 = shalt.err (!%p2157_p3)
}
  0x49   : > { %s2161_s13 = scalar_lea.vmem %s2516_s16, 512  ;;  %p2169_p12 = scmp.lt.s32.totalorder %s2516_s16, %s2516_s16 }
  0x4a   : > { %p2162_p5 = scmp.ne.s32.totalorder %s2516_s16, %s2161_s13  ;;  %p2170_p0 = scmp.lt.s32.totalorder %s2161_s13, %s2161_s13 }
  0x4c   : > { %p2164_p7 = pnand %p2162_p5, %p2528_p13  ;;  %p2171_p1 = por %p2170_p0, %p2169_p12 }
  0x4e   : > { %p2165_p9 = pneg %p2164_p7 }
  0x50   : > { %p2172_p2 = pnand %p2171_p1, %p2165_p9 }
  0x52   : > { %2175 = shalt.err (!%p2172_p2)
}
  0x53   : > { %1996 = dma.hbm_to_vmem [thread:$0]  (!%p2512_p11), %s2933_s3, 512, %s2516_s16, [#allocation11], %s2918_s19, %s2918_s19, %s2396_s20  }
  0x54   : > { %s2934_s4 = sld [smem:[#allocation27_spill]] }
  0x5a   : > { %s2176_s22 = scalar_lea.hbm %s2934_s4, 512 }
  0x5b   : > { %p2177_p6 = scmp.ne.s32.totalorder %s2934_s4, %s2176_s22  ;;  %p2183_p5 = scmp.lt.u32.totalorder %s2176_s22, %s2934_s4 }
  0x5d   : > { %p2179_p10 = pnand %p2177_p6, %p2528_p13 }
  0x5f   : > { %p2180_p3 = pneg %p2179_p10 }
  0x61   : > { %p2185_p7 = pnand %p2183_p5, %p2180_p3 }
  0x63   : > { %2188 = shalt.err (!%p2185_p7)
}
  0x64   : > { %s2189_s13 = scalar_lea.vmem %s271_s18, 512  ;;  %p2197_p1 = scmp.lt.s32.totalorder %s271_s18, %s271_s18 }
  0x65   : > { %p2190_p9 = scmp.ne.s32.totalorder %s271_s18, %s2189_s13  ;;  %p2198_p2 = scmp.lt.s32.totalorder %s2189_s13, %s2189_s13 }
  0x67   : > { %p2192_p12 = pnand %p2190_p9, %p2528_p13  ;;  %p2199_p4 = por %p2198_p2, %p2197_p1 }
  0x69   : > { %p2193_p0 = pneg %p2192_p12 }
  0x6b   : > { %p2200_p8 = pnand %p2199_p4, %p2193_p0 }
  0x6d   : > { %2203 = shalt.err (!%p2200_p8)
}
  0x6e   : > { %1999 = dma.hbm_to_vmem [thread:$0]  (!%p2512_p11), %s2934_s4, 512, %s271_s18, [#allocation11], %s2918_s19, %s2918_s19, %s2396_s20  }
  0x6f   : > { %s2397_s24 = smov [#allocation13]   ;;  %s2204_s23 = scalar_lea.hbm %s2909_s5, 512 }
  0x70   : > { %s283_s10 = sshll.u32 %s2397_s24, 4  ;;  %p2205_p4 = scmp.ne.s32.totalorder %s2909_s5, %s2204_s23  ;;  %s284_s10 = int_to_ptr.vmem [resolvable:$true] %s283_s10 }
  0x71   : > { %p2211_p10 = scmp.lt.u32.totalorder %s2204_s23, %s2909_s5 }
  0x72   : > { %p2207_p8 = pnand %p2205_p4, %p2528_p13 }
  0x74   : > { %p2208_p6 = pneg %p2207_p8 }
  0x76   : > { %p2213_p3 = pnand %p2211_p10, %p2208_p6 }
  0x78   : > { %2216 = shalt.err (!%p2213_p3)
}
  0x79   : > { %s2217_s18 = scalar_lea.vmem %s284_s10, 512  ;;  %p2225_p12 = scmp.lt.s32.totalorder %s284_s10, %s284_s10 }
  0x7a   : > { %p2218_p5 = scmp.ne.s32.totalorder %s284_s10, %s2217_s18  ;;  %p2226_p0 = scmp.lt.s32.totalorder %s2217_s18, %s2217_s18 }
  0x7c   : > { %p2220_p7 = pnand %p2218_p5, %p2528_p13  ;;  %p2227_p1 = por %p2226_p0, %p2225_p12 }
  0x7e   : > { %p2221_p9 = pneg %p2220_p7 }
  0x80   : > { %p2228_p2 = pnand %p2227_p1, %p2221_p9 }
  0x82   : > { %2231 = shalt.err (!%p2228_p2)
}
  0x83   : > { %2002 = dma.hbm_to_vmem [thread:$0]  (!%p2512_p11), %s2909_s5, 512, %s284_s10, [#allocation14], %s2918_s19, %s2918_s19, %s2396_s20  }
  0x84   : > { %s40_s8 = sadd.s32 1, %s2386_s28  ;;  %s49_s14 = sadd.s32 1, %s2378_s26 }
  0x85   : > { %p42_p13 = scmp.ge.s32.totalorder %s40_s8, 2  ;;  %p56_p4 = scmp.ne.s32.totalorder %s2378_s26, %s2374_s25 }
  0x86   : > { %p57_p8 = scmp.eq.s32.totalorder %s2390_s29, 0  ;;  %p2018_p6 = scmp.lt.s32.totalorder %s2390_s29, 2 }
  0x87   : > { %s2961_s8 = smov (%p42_p13, %s40_s8), 0  ;;  %p2935_p3 = scmp.eq.s32.totalorder %s2482_s30, 1 }
  0x88   : > { %p58_p10 = por %p57_p8, %p56_p4  ;;  %s44_s21 = ssub.s32 %s2386_s28, %s2961_s8 }
  0x89   : > { %p2631_p5 = por %p2935_p3, %p56_p4  ;;  %s2638_s22 = sand.u32 1, %s2378_s26  }
  0x8a   : > { %p47_p11 = scmp.eq.s32.totalorder %s44_s21, 0  ;;  %s1760_s10 = sshll.u32 %s2638_s22, 4 }
  0x8b   : > { %s2936_s24 = scalar_select %p2631_p5, 1, 0 }
  0x8c   : > { %s1808_s23 = sshll.u32 %s2386_s28, 8  ;;  %s2937_s0 = sld [smem:[#allocation24_spill]] }
  0x8d   : > { %s2643_s12 = scalar_select %p47_p11, %s2378_s26, %s49_s14  }
  0x8e   : > { %s304_s18 = scalar_lea.vmem [#allocation4], %s1760_s10  ;;  %p2652_p7 = pnand %p2018_p6, %p58_p10 }
  0x8f   : > { %s313_s16 = sshll.u32 %s304_s18, 4  ;;  %s301_s21 = scalar_lea.sflag [#allocation5], %s2638_s22  ;;  %s2656_s16 = int_to_ptr.vmem [resolvable:$true] %s313_s16 }
  0x90   : > { %p2234_p12 = pneg %p2652_p7 }
  0x92   : > { %s2648_s13 = scalar_lea.hbm %s2937_s0, %s1808_s23  ;;  %s2237_s17 = scalar_lea.hbm %s2937_s0, 512 }
  0x93   : > { %s2232_s15 = scalar_lea.hbm %s2648_s13, 256  ;;  %p2238_p2 = scmp.lt.u32.totalorder %s2648_s13, %s2937_s0 }
  0x94   : > { %p2233_p9 = scmp.ne.s32.totalorder %s2648_s13, %s2232_s15  ;;  %p2239_p13 = scmp.lt.u32.totalorder %s2237_s17, %s2232_s15 }
  0x95   : > { %p2241_p8 = scmp.lt.u32.totalorder %s2232_s15, %s2648_s13 }
  0x96   : > { %p2235_p0 = pnand %p2234_p12, %p2233_p9  ;;  %p2240_p4 = por %p2239_p13, %p2238_p2 }
  0x98   : > { %p2236_p1 = pneg %p2235_p0  ;;  %p2242_p6 = por %p2241_p8, %p2240_p4 }
  0x9a   : > { %p2243_p10 = pnand %p2242_p6, %p2236_p1 }
  0x9c   : > { %2246 = shalt.err (!%p2243_p10)
}
  0x9d   : > { %s2247_s14 = scalar_lea.vmem %s2656_s16, 256  ;;  %s2398_s10 = smov [#allocation4]  }
  0x9e   : > { %p2248_p3 = scmp.ne.s32.totalorder %s2656_s16, %s2247_s14  ;;  %s2252_s23 = sshll.u32 %s2398_s10, 4  ;;  %s2253_s23 = int_to_ptr.vmem [resolvable:$false] %s2252_s23 }
  0x9f   : > { %s2254_s19 = scalar_lea.vmem %s2253_s23, 512  ;;  %p2255_p0 = scmp.lt.s32.totalorder %s2656_s16, %s2253_s23 }
  0xa0   : > { %p2250_p11 = pnand %p2248_p3, %p2234_p12  ;;  %p2256_p2 = scmp.lt.s32.totalorder %s2254_s19, %s2247_s14 }
  0xa2   : > { %p2251_p9 = pneg %p2250_p11  ;;  %p2257_p13 = por %p2256_p2, %p2255_p0 }
  0xa4   : > { %p2258_p4 = pnand %p2257_p13, %p2251_p9 }
  0xa6   : > { %2261 = shalt.err (!%p2258_p4)
}
  0xa7   : > { %s2939_s15 = smov 128   ;;  %s1763_s17 = sshll.u32 %s2638_s22, 3 }
  0xa8   : > { %2006 = dma.hbm_to_vmem [thread:$0]  (!%p2652_p7), %s2648_s13, 256, %s2656_s16, %s301_s21, %s2939_s15, %s2939_s15, %s2396_s20  }
  0xa9   : > { %s1764_s18 = sshll.u32 %s2386_s28, 7  ;;  %s327_s19 = scalar_lea.vmem [#allocation7], %s1763_s17 }
  0xaa   : > { %s2695_s23 = scalar_lea.hbm %s2905_s1, %s1764_s18  ;;  %s334_s0 = sshll.u32 %s327_s19, 4  ;;  %s335_s0 = int_to_ptr.vmem [resolvable:$true] %s334_s0 }
  0xab   : > { %s2940_s2 = sand.u32 1, %s2390_s29   ;;  %s2262_s4 = scalar_lea.hbm %s2695_s23, 128 }
  0xac   : > { %s324_s3 = scalar_lea.sflag [#allocation8], %s2940_s2  ;;  %p2263_p1 = scmp.ne.s32.totalorder %s2695_s23, %s2262_s4 }
  0xad   : > { %s2267_s13 = scalar_lea.hbm %s2905_s1, 256  ;;  %p2268_p10 = scmp.lt.u32.totalorder %s2695_s23, %s2905_s1 }
  0xae   : > { %p2265_p8 = pnand %p2263_p1, %p2234_p12  ;;  %p2269_p3 = scmp.lt.u32.totalorder %s2267_s13, %s2262_s4 }
  0xaf   : > { %p2271_p9 = scmp.lt.u32.totalorder %s2262_s4, %s2695_s23 }
  0xb0   : > { %p2266_p6 = pneg %p2265_p8  ;;  %p2270_p11 = por %p2269_p3, %p2268_p10 }
  0xb2   : > { %p2272_p0 = por %p2271_p9, %p2270_p11 }
  0xb4   : > { %p2273_p2 = pnand %p2272_p0, %p2266_p6 }
  0xb6   : > { %2276 = shalt.err (!%p2273_p2)
}
  0xb7   : > { %s2277_s2 = scalar_lea.vmem %s335_s0, 128  ;;  %s2399_s15 = smov [#allocation7]  }
  0xb8   : > { %p2278_p13 = scmp.ne.s32.totalorder %s335_s0, %s2277_s2  ;;  %s2282_s17 = sshll.u32 %s2399_s15, 4  ;;  %s2283_s17 = int_to_ptr.vmem [resolvable:$false] %s2282_s17 }
  0xb9   : > { %s2284_s18 = scalar_lea.vmem %s2283_s17, 256  ;;  %p2285_p8 = scmp.lt.s32.totalorder %s335_s0, %s2283_s17 }
  0xba   : > { %p2280_p4 = pnand %p2278_p13, %p2234_p12  ;;  %p2286_p5 = scmp.lt.s32.totalorder %s2284_s18, %s2277_s2 }
  0xbc   : > { %p2281_p1 = pneg %p2280_p4  ;;  %p2287_p3 = por %p2286_p5, %p2285_p8 }
  0xbe   : > { %p2288_p10 = pnand %p2287_p3, %p2281_p1 }
  0xc0   : > { %2291 = shalt.err (!%p2288_p10)
}
  0xc1   : > { %2009 = dma.hbm_to_vmem [thread:$0]  (!%p2652_p7), %s2695_s23, 128, %s335_s0, %s324_s3  }
  0xc2   : > { %p2941_p6 = scmp.ne.s32.totalorder %s2929_s11, 0 }
  0xc3   : > { %s2721_s4 = sand.u32 (!%p2941_p6), 1, %s2374_s25   ;;  %p2942_p5 = scmp.ne.s32.totalorder (!%p2941_p6), %s2926_s9, 0 }
  0xc4   : > { %343 = sbr.rel (%p2941_p6) target bundleno = 1671 (0x687), region = 48  ;;  %s1766_s14 = sshll.u32 (!%p2941_p6), %s2721_s4, 4 }
  0xc5   : > { %s346_s10 = scalar_lea.sflag (!%p2941_p6), [#allocation5], %s2721_s4  ;;  %s2727_s19 = scalar_lea.vmem (!%p2941_p6), [#allocation4], %s1766_s14 }
  0xcb   : > { %2345 = dma.done.wait (%p2942_p5), %s346_s10, 256  }
  0xcc   : > { %2347 = vsyncadd (%p2942_p5), %s346_s10, 4294967040  ;;  %s354_s0 = sand.u32 1, %s2482_s30   ;;  %s1767_s3 = sshll.u32 %s2721_s4, 3 }
  0xcd   : > { %s355_s11 = scalar_lea.sflag [#allocation8], %s354_s0  ;;  %s2735_s7 = scalar_lea.vmem [#allocation7], %s1767_s3 }
  0xce   : > { %2349 = dma.done.wait (%p2942_p5), %s355_s11, 128  }
  0xcf   : > { %2351 = vsyncadd (%p2942_p5), %s355_s11, 4294967168  ;;  %p2943_p7 = scmp.eq.s32.totalorder %s2482_s30, 0 }
  0xd1   : > { %2353 = dma.done.wait (%p2943_p7), [#allocation8], 512   ;;  %p2944_p12 = pmov %p2943_p7 }
  0xd2   : > { %p2945_p11 = pmov %p2943_p7 }
  0xd3   : > { %2355 = vsyncadd (%p2944_p12), [#allocation8], 4294966784 }
  0xd4   : > { %2357 = dma.done.wait (%p2945_p11), [#allocation11], 1024   ;;  %p2946_p9 = pmov %p2943_p7 }
  0xd5   : > { %p2947_p0 = pmov %p2943_p7 }
  0xd6   : > { %2359 = vsyncadd (%p2946_p9), [#allocation11], 4294966272 }
  0xd7   : > { %2361 = dma.done.wait (%p2947_p0), [#allocation14], 512   ;;  %p2948_p2 = pmov %p2947_p0 }
  0xd8   : > { %v2400_v0 = vmov 0.0|0.0   ;;  %vm2401_vm0 = vmmov 0   ;;  %v2402_v1 = vmov 0.0   ;;  %v423_v2 = vld [vmem:[#allocation10] sm:$0xff]  ;;  %v424_v3 = vld [vmem:[#allocation10 + $0x8] sm:$0xff]  ;;  %v425_v4 = vld [vmem:[#allocation10 + $0x10] sm:$0xff] }
  0xd9   : > { %2363 = vsyncadd (%p2948_p2), [#allocation14], 4294966784  ;;  %1940 = vmatprep.subr.bf16.mxu0 %v2400_v0  ;;  %1864 = vmatprep.mubr.msk.f32.mxu0 %vm2401_vm0, %v2402_v1  ;;  %v1941_v5 = vpack.c.bf16 %v424_v3, %v423_v2  ;;  %v426_v6 = vld [vmem:[#allocation10 + $0x18] sm:$0xff]  ;;  %v612_v7 = vld [vmem:[#allocation9] sm:$0xff]  ;;  %vm431_vm1 = vcmask 261120   ;;  %vm593_vm2 = vcmask 64512  }
  0xda   : > { %1946 = vmatprep.subr.bf16.mxu1 %v2400_v0  ;;  %1875 = vmatprep.mubr.msk.f32.mxu1 %vm2401_vm0, %v2402_v1  ;;  %v613_v8 = vld [vmem:[#allocation9 + $0x8] sm:$0xff]  ;;  %v1944_v9 = vpack.c.bf16 %v426_v6, %v425_v4  ;;  %v505_v10 = vld [vmem:[#allocation12] sm:$0xff]  ;;  %v614_v13 = vld [vmem:[#allocation9 + $0x10] sm:$0xff]  ;;  %s2403_s23 = smov 104   ;;  %s2404_s20 = smov 120   ;;  %vm1491_vm3 = vcmask 130048  }
  0xdb   : > { %1942 = vmatpush3.bf16.msra.mxu0 %v1941_v5  ;;  %v1952_v11 = vpack.c.bf16 %v613_v8, %v612_v7  ;;  %v506_v12 = vld [vmem:[#allocation12 + $0x8] sm:$0xff]  ;;  %v615_v14 = vld [vmem:[#allocation9 + $0x18] sm:$0xff]  ;;  %v412_v18 = vld [vmem:[%s2727_s19] sm:$0xff]  ;;  %s2405_s16 = smov 112   ;;  %s2406_s15 = smov 8   ;;  %vm1494_vm4 = vcmask 195584  }
  0xdc   : > { %1943 = vmatprep.subr.bf16.mxu0 %v2400_v0  ;;  %v1947_v15 = vpack.c.bf16 %v506_v12, %v505_v10  ;;  %v422_v16 = vld [vmem:[%s2735_s7] sm:$0xff]  ;;  %v1956_v17 = vpack.c.bf16 %v615_v14, %v614_v13  ;;  %v413_v19 = vld [vmem:[%s2727_s19 + $0x8] sm:$0xff]  ;;  %s2407_s17 = smov 16   ;;  %s2408_s18 = smov 24  }
  0xdd   : > { %v507_v20 = vld [vmem:[#allocation12 + $0x10] sm:$0xff]  ;;  %v508_v21 = vld [vmem:[#allocation12 + $0x18] sm:$0xff]  ;;  %s409_s0 = scalar_lea.vmem [#allocation15], %s1766_s14  ;;  %s1809_s11 = sshll.u32 %s2382_s27, 8 }
  0xde   : > { %1948 = vmatpush3.bf16.msra.mxu1 %v1947_v15  ;;  %v1950_v22 = vpack.c.bf16 %v508_v21, %v507_v20  ;;  %v1773_v23 = vld [vmem:[%s2910_s6 + $0x1] ss:$0 sm:$0xff]  ;;  %v1777_v27 = vld [vmem:[%s2910_s6] ss:$0 sm:$0xff]  ;;  %v1775_v33 = vld [vmem:[%s2910_s6 + $0x2] ss:$0 sm:$0xff] }
  0xdf   : > { %1945 = vmatpush3.bf16.msra.mxu0 %v1944_v9  ;;  %1949 = vmatprep.subr.bf16.mxu1 %v2400_v0  ;;  %s1604_s3 = sshll.u32 %s409_s0, 4  ;;  %s2949_s9 = sld [smem:[#allocation28_spill]]  ;;  %s2847_s3 = int_to_ptr.vmem [resolvable:$true] %s1604_s3 }
  0xe0   : > { %1953 = vmatprep.subr.bf16.mxu0 %v1952_v11  ;;  %s1589_s14 = scalar_lea.sflag [#allocation6], %s2721_s4  ;;  %s2292_s27 = scalar_lea.vmem %s2847_s3, 256 }
  0xe1   : > { %p2293_p13 = scmp.ne.s32.totalorder %s2847_s3, %s2292_s27  ;;  %p2950_p4 = scmp.ne.s32.totalorder %s2936_s24, 0 }
  0xe2   : > { %1865 = vmatmul.mubr.msk.f32.vlgmr.msra.gmra.mrb[0].mxu0 %vm431_vm1, %v422_v16  ;;  %1951 = vmatpush3.bf16.msra.mxu1 %v1950_v22 }
  0xe3   : > { %1955 = vmatpush3.bf16.msra.mxu0 %v1952_v11  ;;  %1886 = vmatprep.mubr.msk.f32.mxu0 %vm431_vm1, %v412_v18  ;;  %p2294_p1 = pnand %p2293_p13, %p2950_p4 }
  0xe4   : > { %1957 = vmatprep.subr.bf16.mxu0 %v1956_v17 }
  0xe5   : > { %1876 = vmatmul.mubr.msk.f32.vlgmr.msra.gmra.mrb[0].mxu1 %vm431_vm1, %v422_v16  ;;  %p2295_p8 = pneg %p2294_p1 }
  0xe7   : > { %1959 = vmatpush3.bf16.msra.mxu0 %v1956_v17 }
  0xea   : > { %1887 = vmatmul.mubr.msk.f32.vlgmr.msra.gmra.mrb[2].mxu0 %vm431_vm1, %v413_v19 }
 0x1b5   : > { %v501_v24 = vpop.f32.mrb[0].mxu0 }
 0x1b6   : > { %v502_v25 = vadd.f32 %v1773_v23, %v501_v24  ;;  %v1866_v26 = vpop.f32.mrb[1].mxu0 }
 0x1b8   : > { %594 = vst.msk [vmem:[#allocation2] sm:$0xff] %vm593_vm2, %v502_v25  ;;  %590 = vrot.lane.b32.xlu1 %v502_v25, %s2403_s23  ;;  %584 = vrot.lane.b32.xlu0 %v502_v25, %s2404_s20  ;;  %v579_v34 = vpop.f32.mrb[0].mxu1 }
 0x1b9   : > { %v2783_v35 = vadd.f32 %v1775_v33, %v579_v34  ;;  %v1877_v36 = vpop.f32.mrb[1].mxu1 }
 0x1bb   : > { %608 = vst.msk [vmem:[#allocation3] sm:$0xff] %vm593_vm2, %v2783_v35 }
 0x1bc   : > { %587 = vrot.lane.b32.xlu0 %v502_v25, %s2405_s16 }
 0x1bd   : > { %v1888_v28 = vpop.f32.mrb[2].mxu0 }
 0x1be   : > { %v699_v29 = vadd.f32 %v1888_v28, %v1777_v27  ;;  %v693_v30 = vpop.f32.mrb[3].mxu0 }
 0x1bf   : > { %v694_v31 = vadd.f32 %v1777_v27, %v693_v30  ;;  %v716_v32 = vld [vmem:[#allocation2] sm:$0xff] }
 0x1c0   : > { %1889 = vmatprep.subr.msk.mxu1 %vm593_vm2, %v716_v32  ;;  %706 = vrot.lane.b32.xlu0 %v699_v29, %s2404_s20 }
 0x1c1   : > { %1890 = vmatpush3.xpose.msk.msra.mxu1 %vm593_vm2, %v716_v32  ;;  %704 = vrot.lane.b32.xlu1 %v694_v31, %s2404_s20 }
 0x1c2   : > { %1891 = vmatprep.mubr.msk.f32.mxu1 %vm593_vm2, %v694_v31  ;;  %v720_v49 = vld [vmem:[#allocation3] sm:$0xff] }
 0x1c3   : > { %1909 = vmatprep.subr.mxu0 %v720_v49 }
 0x1c4   : > { %710 = vrot.lane.b32.xlu0 %v699_v29, %s2405_s16  ;;  %1892 = vmatmul.mubr.msk.f32.vlgmr.msra.gmra.mrb[2].mxu1 %vm593_vm2, %v699_v29 }
 0x1c5   : > { %708 = vrot.lane.b32.xlu1 %v694_v31, %s2405_s16  ;;  %1910 = vmatpush3.msra.mxu0 %v720_v49 }
 0x1c8   : > { %714 = vrot.lane.b32.xlu0 %v699_v29, %s2403_s23 }
 0x1c9   : > { %712 = vrot.lane.b32.xlu1 %v694_v31, %s2403_s23 }
 0x22a   : > { %v591_v37 = vpop.permute.xlu1 %590  ;;  %v585_v38 = vpop.permute.xlu0 %584 }
 0x22b   : > { %597 = vst.msk [vmem:[#allocation2 + $0x18] sm:$0xff] %vm593_vm2, %v591_v37  ;;  %595 = vst.msk [vmem:[#allocation2 + $0x8] sm:$0xff] %vm593_vm2, %v585_v38 }
 0x22e   : > { %v588_v39 = vpop.permute.xlu0 %587 }
 0x22f   : > { %596 = vst.msk [vmem:[#allocation2 + $0x10] sm:$0xff] %vm593_vm2, %v588_v39 }
 0x232   : > { %v707_v40 = vpop.permute.xlu0 %706  ;;  %v717_v41 = vld [vmem:[#allocation2 + $0x8] sm:$0xff]  ;;  %v719_v46 = vld [vmem:[#allocation2 + $0x18] sm:$0xff] }
 0x233   : > { %1894 = vmatprep.subr.msk.mxu1 %vm593_vm2, %v717_v41  ;;  %v705_v42 = vpop.permute.xlu1 %704 }
 0x234   : > { %1895 = vmatpush3.xpose.msk.msra.mxu1 %vm593_vm2, %v717_v41  ;;  %1896 = vmatprep.mubr.msk.f32.mxu1 %vm593_vm2, %v705_v42 }
 0x236   : > { %v718_v43 = vld [vmem:[#allocation2 + $0x10] sm:$0xff]  ;;  %v711_v45 = vpop.permute.xlu0 %710 }
 0x237   : > { %v709_v44 = vpop.permute.xlu1 %708  ;;  %1897 = vmatmul.mubr.msk.f32.vlgmr.msra.gmra.mrb[4].mxu1 %vm593_vm2, %v707_v40  ;;  %1899 = vmatprep.subr.msk.mxu1 %vm593_vm2, %v718_v43 }
 0x238   : > { %1900 = vmatpush3.xpose.msk.msra.mxu1 %vm593_vm2, %v718_v43  ;;  %1901 = vmatprep.mubr.msk.f32.mxu1 %vm593_vm2, %v709_v44 }
 0x239   : > { %1904 = vmatprep.subr.msk.mxu1 %vm593_vm2, %v719_v46 }
 0x23a   : > { %v715_v48 = vpop.permute.xlu0 %714 }
 0x23b   : > { %v713_v47 = vpop.permute.xlu1 %712  ;;  %1902 = vmatmul.mubr.msk.f32.vlgmr.msra.gmra.mrb[6].mxu1 %vm593_vm2, %v711_v45 }
 0x23c   : > { %1905 = vmatpush3.xpose.msk.msra.mxu1 %vm593_vm2, %v719_v46  ;;  %1906 = vmatprep.mubr.msk.f32.mxu1 %vm593_vm2, %v713_v47 }
 0x23f   : > { %1907 = vmatmul.mubr.msk.f32.vlgmr.msra.gmra.mrb[8].mxu1 %vm593_vm2, %v715_v48 }
 0x297   : > { %v1893_v50 = vpop.f32.mrb[2].mxu1 }
 0x298   : > { %v798_v51 = vpop.f32.mrb[3].mxu1  ;;  %v1056_v52 = vsel %vm593_vm2, %v1893_v50, -inf }
 0x299   : > { %1057 = vmax.xlane.f32.xlu0 %v1056_v52  ;;  %v1053_v53 = vsel %vm593_vm2, %v798_v51, -inf }
 0x29a   : > { %1054 = vmax.xlane.f32.xlu1 %v1053_v53 }
 0x30a   : > { %v1898_v54 = vpop.f32.mrb[4].mxu1 }
 0x30b   : > { %v880_v55 = vpop.f32.mrb[5].mxu1  ;;  %v1062_v56 = vsel %vm593_vm2, %v1898_v54, -inf }
 0x30c   : > { %1063 = vmax.xlane.f32.xlu1 %v1062_v56  ;;  %v1059_v57 = vsel %vm593_vm2, %v880_v55, -inf }
 0x30d   : > { %1060 = vmax.xlane.f32.xlu0 %v1059_v57 }
 0x30e   : > { %v1903_v58 = vpop.f32.mrb[6].mxu1 }
 0x30f   : > { %v962_v59 = vpop.f32.mrb[7].mxu1  ;;  %v1068_v60 = vsel %vm593_vm2, %v1903_v58, -inf }
 0x310   : > { %1069 = vmax.xlane.f32.xlu1 %v1068_v60  ;;  %v1065_v61 = vsel %vm593_vm2, %v962_v59, -inf }
 0x311   : > { %1066 = vmax.xlane.f32.xlu0 %v1065_v61 }
 0x312   : > { %v1908_v62 = vpop.f32.mrb[8].mxu1 }
 0x313   : > { %v1044_v63 = vpop.f32.mrb[9].mxu1  ;;  %v1074_v0 = vsel %vm593_vm2, %v1908_v62, -inf }
 0x314   : > { %1075 = vmax.xlane.f32.xlu1 %v1074_v0  ;;  %v1071_v1 = vsel %vm593_vm2, %v1044_v63, -inf }
 0x315   : > { %1072 = vmax.xlane.f32.xlu0 %v1071_v1 }
 0x326   : > { %v1058_v2 = vpop.xlane.xlu0 %1057 }
 0x327   : > { %v1078_v3 = vsub.f32 %v1893_v50, %v1058_v2  ;;  %v1055_v4 = vpop.xlane.xlu1 %1054 }
 0x328   : > { %v1077_v5 = vsub.f32 %v798_v51, %v1055_v4 }
 0x329   : > { %v1087_v6 = vmul.f32 1.442695, %v1078_v3 }
 0x32a   : > { %v1085_v7 = vmul.f32 1.442695, %v1077_v5 }
 0x32b   : > { %2088 = vpow2.f32 %v1087_v6 }
 0x32c   : > { %2090 = vpow2.f32 %v1085_v7 }
 0x335   : > { %v2089_v8 = vpop.eup %2088 }
 0x336   : > { %v2091_v9 = vpop.eup %2090  ;;  %v1104_v10 = vsel %vm593_vm2, %v2089_v8, 0.0 }
 0x337   : > { %1105 = vadd.xlane.f32.xlu1 %v1104_v10  ;;  %v1101_v11 = vsel %vm593_vm2, %v2091_v9, 0.0  ;;  %v1497_v10 = vld [vmem:[#allocation13] sm:$0xff] }
 0x338   : > { %1102 = vadd.xlane.f32.xlu0 %v1101_v11  ;;  %v1498_v11 = vld [vmem:[#allocation13 + $0x8] sm:$0xff] }
 0x399   : > { %v1064_v12 = vpop.xlane.xlu1 %1063 }
 0x39a   : > { %v1080_v13 = vsub.f32 %v1898_v54, %v1064_v12  ;;  %v1061_v14 = vpop.xlane.xlu0 %1060  ;;  %v1960_v12 = vpack.c.bf16 %v1498_v11, %v1497_v10 }
 0x39b   : > { %v1079_v15 = vsub.f32 %v880_v55, %v1061_v14  ;;  %v1500_v14 = vld [vmem:[#allocation13 + $0x18] sm:$0xff] }
 0x39c   : > { %v1091_v16 = vmul.f32 1.442695, %v1080_v13  ;;  %v1499_v13 = vld [vmem:[#allocation13 + $0x10] sm:$0xff] }
 0x39d   : > { %v1089_v17 = vmul.f32 1.442695, %v1079_v15  ;;  %v1070_v18 = vpop.xlane.xlu1 %1069  ;;  %v1964_v15 = vpack.c.bf16 %v1500_v14, %v1499_v13 }
 0x39e   : > { %2092 = vpow2.f32 %v1091_v16  ;;  %v1082_v19 = vsub.f32 %v1903_v58, %v1070_v18  ;;  %v1067_v20 = vpop.xlane.xlu0 %1066 }
 0x39f   : > { %2094 = vpow2.f32 %v1089_v17  ;;  %v1081_v21 = vsub.f32 %v962_v59, %v1067_v20 }
 0x3a0   : > { %v1095_v22 = vmul.f32 1.442695, %v1082_v19 }
 0x3a1   : > { %v1093_v23 = vmul.f32 1.442695, %v1081_v21  ;;  %v1076_v24 = vpop.xlane.xlu1 %1075 }
 0x3a2   : > { %2096 = vpow2.f32 %v1095_v22  ;;  %v1084_v25 = vsub.f32 %v1908_v62, %v1076_v24  ;;  %v1073_v26 = vpop.xlane.xlu0 %1072 }
 0x3a3   : > { %2098 = vpow2.f32 %v1093_v23  ;;  %v1083_v27 = vsub.f32 %v1044_v63, %v1073_v26 }
 0x3a4   : > { %v1099_v28 = vmul.f32 1.442695, %v1084_v25 }
 0x3a5   : > { %v1097_v29 = vmul.f32 1.442695, %v1083_v27 }
 0x3a6   : > { %2100 = vpow2.f32 %v1099_v28 }
 0x3a7   : > { %2102 = vpow2.f32 %v1097_v29 }
 0x3a8   : > { %v2093_v30 = vpop.eup %2092 }
 0x3a9   : > { %v2095_v31 = vpop.eup %2094  ;;  %v1110_v32 = vsel %vm593_vm2, %v2093_v30, 0.0 }
 0x3aa   : > { %1111 = vadd.xlane.f32.xlu1 %v1110_v32  ;;  %v1107_v33 = vsel %vm593_vm2, %v2095_v31, 0.0 }
 0x3ab   : > { %1108 = vadd.xlane.f32.xlu0 %v1107_v33 }
 0x3ac   : > { %v2097_v34 = vpop.eup %2096 }
 0x3ad   : > { %v2099_v36 = vpop.eup %2098  ;;  %v1116_v37 = vsel %vm593_vm2, %v2097_v34, 0.0 }
 0x3ae   : > { %1117 = vadd.xlane.f32.xlu1 %v1116_v37  ;;  %v1113_v38 = vsel %vm593_vm2, %v2099_v36, 0.0 }
 0x3af   : > { %1114 = vadd.xlane.f32.xlu0 %v1113_v38 }
 0x3b0   : > { %v2101_v39 = vpop.eup %2100 }
 0x3b1   : > { %v2103_v40 = vpop.eup %2102  ;;  %v1122_v41 = vsel %vm593_vm2, %v2101_v39, 0.0 }
 0x3b2   : > { %1123 = vadd.xlane.f32.xlu1 %v1122_v41  ;;  %v1119_v42 = vsel %vm593_vm2, %v2103_v40, 0.0 }
 0x3b3   : > { %1120 = vadd.xlane.f32.xlu0 %v1119_v42 }
 0x3c3   : > { %602 = vrot.lane.b32.xlu1 %v2783_v35, %s2405_s16 }
 0x3c4   : > { %v1106_v43 = vpop.xlane.xlu1 %1105 }
 0x3c5   : > { %2104 = vrcp.f32 %v1106_v43  ;;  %v1103_v44 = vpop.xlane.xlu0 %1102 }
 0x3c6   : > { %2106 = vrcp.f32 %v1103_v44 }
 0x3c7   : > { %605 = vrot.lane.b32.xlu1 %v2783_v35, %s2403_s23  ;;  %s2852_s23 = scalar_lea.hbm %s2949_s9, %s1809_s11 }
 0x3c9   : > { %599 = vrot.lane.b32.xlu0 %v2783_v35, %s2404_s20  ;;  %s2409_s20 = smov [#allocation15]  }
 0x3ca   : > { %s2296_s22 = sshll.u32 %s2409_s20, 4  ;;  %s2297_s22 = int_to_ptr.vmem [resolvable:$false] %s2296_s22 }
 0x3cb   : > { %s2298_s13 = scalar_lea.vmem %s2297_s22, 512  ;;  %p2299_p3 = scmp.lt.s32.totalorder %s2847_s3, %s2297_s22 }
 0x3cc   : > { %p2300_p10 = scmp.lt.s32.totalorder %s2298_s13, %s2292_s27 }
 0x3ce   : > { %p2301_p6 = por %p2300_p10, %p2299_p3 }
 0x3cf   : > { %v2105_v45 = vpop.eup %2104 }
 0x3d0   : > { %v2107_v46 = vpop.eup %2106  ;;  %v1134_v48 = vmul.f32 %v2105_v45, %v2089_v8  ;;  %p2302_p5 = pnand %p2301_p6, %p2295_p8 }
 0x3d1   : > { %v1133_v47 = vmul.f32 %v2107_v46, %v2091_v9 }
 0x3d3   : > { %1911 = vmatprep.mubr.msk.f32.mxu0 %vm593_vm2, %v1133_v47 }
 0x3d4   : > { %1912 = vmatmul.mubr.msk.f32.vlgmr.msra.gmra.mrb[4].mxu0 %vm593_vm2, %v1134_v48 }
 0x437   : > { %v1112_v49 = vpop.xlane.xlu1 %1111 }
 0x438   : > { %v1109_v50 = vpop.xlane.xlu0 %1108 }
 0x439   : > { %2108 = vrcp.f32 %v1109_v50 }
 0x43b   : > { %v1118_v51 = vpop.xlane.xlu1 %1117 }
 0x43c   : > { %v1115_v52 = vpop.xlane.xlu0 %1114 }
 0x43d   : > { %2110 = vrcp.f32 %v1115_v52 }
 0x43e   : > { %2112 = vrcp.f32 %v1118_v51 }
 0x43f   : > { %v1124_v53 = vpop.xlane.xlu1 %1123  ;;  %2114 = vrcp.f32 %v1112_v49 }
 0x440   : > { %v1121_v54 = vpop.xlane.xlu0 %1120 }
 0x441   : > { %2116 = vrcp.f32 %v1121_v54 }
 0x442   : > { %2118 = vrcp.f32 %v1124_v53 }
 0x443   : > { %v2109_v35 = vpop.eup %2108  ;;  %v603_v55 = vpop.permute.xlu1 %602 }
 0x444   : > { %610 = vst.msk [vmem:[#allocation3 + $0x10] sm:$0xff] %vm593_vm2, %v603_v55  ;;  %v600_v56 = vpop.permute.xlu0 %599  ;;  %v1135_v57 = vmul.f32 %v2109_v35, %v2095_v31 }
 0x445   : > { %609 = vst.msk [vmem:[#allocation3 + $0x8] sm:$0xff] %vm593_vm2, %v600_v56 }
 0x446   : > { %1916 = vmatprep.mubr.msk.f32.mxu1 %vm593_vm2, %v1135_v57 }
 0x447   : > { %v2111_v58 = vpop.eup %2110  ;;  %v606_v59 = vpop.permute.xlu1 %605 }
 0x448   : > { %611 = vst.msk [vmem:[#allocation3 + $0x18] sm:$0xff] %vm593_vm2, %v606_v59  ;;  %v1137_v60 = vmul.f32 %v2111_v58, %v2099_v36  ;;  %v2113_v61 = vpop.eup %2112 }
 0x449   : > { %v2115_v62 = vpop.eup %2114  ;;  %v1138_v1 = vmul.f32 %v2113_v61, %v2097_v34  ;;  %v1800_v34 = vld [vmem:[%s2910_s6 + $0x3] ss:$0 sm:$0xff] }
 0x44a   : > { %1921 = vmatprep.mubr.msk.f32.mxu0 %vm593_vm2, %v1137_v60  ;;  %v1136_v3 = vmul.f32 %v2115_v62, %v2093_v30 }
 0x44b   : > { %v2117_v63 = vpop.eup %2116  ;;  %v722_v0 = vld [vmem:[#allocation3 + $0x10] sm:$0xff] }
 0x44c   : > { %1919 = vmatprep.subr.mxu0 %v722_v0  ;;  %v721_v2 = vld [vmem:[#allocation3 + $0x8] sm:$0xff]  ;;  %v2119_v4 = vpop.eup %2118  ;;  %v1139_v5 = vmul.f32 %v2117_v63, %v2103_v40 }
 0x44d   : > { %1914 = vmatprep.subr.mxu1 %v721_v2  ;;  %1920 = vmatpush3.msra.mxu0 %v722_v0  ;;  %v1140_v7 = vmul.f32 %v2119_v4, %v2101_v39 }
 0x44e   : > { %1915 = vmatpush3.msra.mxu1 %v721_v2  ;;  %1922 = vmatmul.mubr.msk.f32.vlgmr.msra.gmra.mrb[6].mxu0 %vm593_vm2, %v1138_v1 }
 0x44f   : > { %1917 = vmatmul.mubr.msk.f32.vlgmr.msra.gmra.mrb[10].mxu1 %vm593_vm2, %v1136_v3  ;;  %v723_v6 = vld [vmem:[#allocation3 + $0x18] sm:$0xff]  ;;  %1961 = vmatprep.subr.bf16.mxu0 %v1960_v12 }
 0x450   : > { %1924 = vmatprep.subr.mxu1 %v723_v6  ;;  %1926 = vmatprep.mubr.msk.f32.mxu1 %vm593_vm2, %v1139_v5 }
 0x451   : > { %1925 = vmatpush3.msra.mxu1 %v723_v6  ;;  %1963 = vmatpush3.bf16.msra.mxu0 %v1960_v12 }
 0x452   : > { %1965 = vmatprep.subr.bf16.mxu0 %v1964_v15 }
 0x453   : > { %1927 = vmatmul.mubr.msk.f32.vlgmr.msra.gmra.mrb[12].mxu1 %vm593_vm2, %v1140_v7 }
 0x455   : > { %1967 = vmatpush3.bf16.msra.mxu0 %v1964_v15 }
 0x4a7   : > { %v1913_v8 = vpop.f32.mrb[4].mxu0 }
 0x4a8   : > { %v1213_v9 = vpop.f32.mrb[5].mxu0 }
 0x521   : > { %v1923_v16 = vpop.f32.mrb[6].mxu0 }
 0x522   : > { %v1918_v17 = vpop.f32.mrb[10].mxu1  ;;  %v1375_v18 = vpop.f32.mrb[7].mxu0 }
 0x523   : > { %1469 = vrot.lane.b32.xlu1 %v1918_v17, %s2406_s15  ;;  %v1294_v19 = vpop.f32.mrb[11].mxu1 }
 0x524   : > { %1467 = vrot.lane.b32.xlu0 %v1294_v19, %s2406_s15 }
 0x526   : > { %v1928_v20 = vpop.f32.mrb[12].mxu1 }
 0x527   : > { %1477 = vrot.lane.b32.xlu1 %v1923_v16, %s2407_s17  ;;  %v1456_v21 = vpop.f32.mrb[13].mxu1 }
 0x528   : > { %1475 = vrot.lane.b32.xlu0 %v1375_v18, %s2407_s17 }
 0x52b   : > { %1485 = vrot.lane.b32.xlu1 %v1928_v20, %s2408_s18 }
 0x52c   : > { %1483 = vrot.lane.b32.xlu0 %v1456_v21, %s2408_s18 }
 0x595   : > { %v1470_v22 = vpop.permute.xlu1 %1469 }
 0x596   : > { %v1468_v23 = vpop.permute.xlu0 %1467  ;;  %v1490_v28 = vsel %vm593_vm2, %v1913_v8, %v1470_v22 }
 0x597   : > { %v1489_v26 = vsel %vm593_vm2, %v1213_v9, %v1468_v23 }
 0x599   : > { %v1478_v24 = vpop.permute.xlu1 %1477 }
 0x59a   : > { %v1476_v25 = vpop.permute.xlu0 %1475  ;;  %v1493_v31 = vsel %vm1491_vm3, %v1490_v28, %v1478_v24 }
 0x59b   : > { %v1492_v29 = vsel %vm1491_vm3, %v1489_v26, %v1476_v25 }
 0x59d   : > { %v1486_v27 = vpop.permute.xlu1 %1485 }
 0x59e   : > { %v1484_v30 = vpop.permute.xlu0 %1483  ;;  %v1496_v33 = vsel %vm1494_vm4, %v1493_v31, %v1486_v27 }
 0x59f   : > { %v1495_v32 = vsel %vm1494_vm4, %v1492_v29, %v1484_v30 }
 0x5a0   : > { %1937 = vmatprep.mubr.msk.f32.mxu0 %vm431_vm1, %v1495_v32 }
 0x5a1   : > { %1938 = vmatmul.mubr.msk.f32.vlgmr.msra.gmra.mrb[8].mxu0 %vm431_vm1, %v1496_v33 }
 0x674   : > { %v1939_v36 = vpop.f32.mrb[8].mxu0 }
 0x675   : > { %v1583_v37 = vadd.f32 %v1939_v36, %v1800_v34  ;;  %v1577_v38 = vpop.f32.mrb[9].mxu0 }
 0x676   : > { %v1578_v39 = vadd.f32 %v1800_v34, %v1577_v38 }
 0x677   : > { %1587 = vst.msk [vmem:[%s409_s0 + $0x8] sm:$0xff] %vm431_vm1, %v1583_v37 }
 0x678   : > { %1586 = vst.msk [vmem:[%s409_s0] sm:$0xff] %vm431_vm1, %v1578_v39 }
 0x679   : > { %2305 = shalt.err (!%p2302_p5)
}
 0x67a   : > { %s2306_s16 = scalar_lea.hbm %s2852_s23, 256  ;;  %s2310_s17 = scalar_lea.hbm %s2949_s9, 512 }
 0x67b   : > { %p2307_p7 = scmp.ne.s32.totalorder %s2852_s23, %s2306_s16  ;;  %p2311_p9 = scmp.lt.u32.totalorder %s2852_s23, %s2949_s9 }
 0x67c   : > { %p2312_p0 = scmp.lt.u32.totalorder %s2310_s17, %s2306_s16  ;;  %p2314_p13 = scmp.lt.u32.totalorder %s2306_s16, %s2852_s23 }
 0x67d   : > { %p2308_p12 = pnand %p2307_p7, %p2950_p4 }
 0x67e   : > { %p2313_p2 = por %p2312_p0, %p2311_p9 }
 0x67f   : > { %p2309_p11 = pneg %p2308_p12 }
 0x680   : > { %p2315_p1 = por %p2314_p13, %p2313_p2 }
 0x682   : > { %p2316_p8 = pnand %p2315_p1, %p2309_p11 }
 0x684   : > { %2319 = shalt.err (!%p2316_p8)
}
 0x685   : > { %s2410_s19 = smov 128  }
 0x686   : > { %1988 = dma.vmem_to_hbm [thread:$0]  (%p2950_p4), %s2847_s3, 256, %s2852_s23, %s1589_s14, %s2410_s19, %s2410_s19, %s2406_s15  }
 0x687 PF: > { %s2951_s0 = sld [smem:[#allocation22_spill]]  ;;  %s2952_s11 = sld [smem:[#allocation23_spill]] }
 0x688   : > { %p2954_p10 = scmp.ge.s32.totalorder %s2390_s29, 2 }
 0x68d   : > { %s1619_s7 = sand.u32 1, %s2951_s0   ;;  %p2953_p3 = scmp.ne.s32.totalorder %s2952_s11, 0 }
 0x68e   : > { %s1620_s30 = scalar_lea.sflag [#allocation6], %s1619_s7 }
 0x68f   : > { %p2011_p6 = pnand %p2954_p10, %p2953_p3 }
 0x691   : > { %2365 = dma.done.wait (!%p2011_p6), %s1620_s30, 256  }
 0x692   : > { %2367 = vsyncadd (!%p2011_p6), %s1620_s30, 4294967040  ;;  %s28_s29 = sadd.s32 1, %s2390_s29   ;;  %s2955_s24 = smov %s2374_s25 }
 0x693   : > { %p25_p5 = scmp.ge.s32.totalorder %s28_s29, 4   ;;  %s2956_s25 = smov %s2378_s26 }
 0x694   : > { %s2957_s26 = smov %s2643_s12  ;;  %s2958_s27 = smov %s2386_s28 }
 0x695   : > { %s2959_s28 = smov %s2961_s8  ;;  %27 = sbr.rel (!%p25_p5) target bundleno = 16 (0x10), region = 126 }
 0x69c   :  { %1625 = vsyncpa [#allocation5], 1 }
 0x69d   :  { %1627 = vsyncpa [#allocation5 + $0x1], 1 }
 0x69e   :  { %1628 = vsyncpa [#allocation8], 1 }
 0x69f   :  { %1630 = vsyncpa [#allocation8 + $0x1], 1 }
 0x6a0   :  { %1631 = vsyncpa [#allocation11], 1 }
 0x6a1   :  { %1632 = vsyncpa [#allocation14], 1 }
 0x6a2   :  { %1633 = vsyncpa [#allocation6], 1 }
 0x6a3   :  { %1635 = vsyncpa [#allocation6 + $0x1], 1 }

</bundles_post_ra>
